<compile_context>
chip_gen: v6e
topology: v6e:2x2x1
jax: 0.10.0
libtpu: 0.0.40
codegen_flags: <defaults>
</compile_context>

<pallas_src>
import math
import functools

import jax
import jax.numpy as jnp
from jax.experimental import pallas as pl
from jax.experimental.pallas import tpu as pltpu


def _round_up(a, b):
    return (a + b - 1) // b * b


def _pick_tile(n, unit, cap):
    """Largest tile <= cap that is a multiple of `unit` and divides n when
    possible (avoids re-padding already-padded arrays); for small n just round
    n up to `unit`."""
    if n <= cap:
        return _round_up(n, unit)
    t = cap - cap % unit
    while t >= unit:
        if n % t == 0:
            return t
        t -= unit
    return cap


# ----------------------------------------------------------------------------
# Matmul + bias kernel:  out = (x @ w_codes) * w_scale (+ bias)
#   x: (tm, tk) bf16, w_codes: (tk, tn) int8, bias: (1, tn) f32,
#   out: (tm, tn) bf16 (intermediate), per-tile abs-max: (8, 128) f32.
# The f32 accumulator lives in VMEM scratch (resident across the K axis); the
# weight quantization scale and the bias are applied in the last-K epilogue,
# which also emits this tile's abs-max (masked to valid rows) so the wrapper
# can form the per-tensor output-quant scale without re-reading the output.
# ----------------------------------------------------------------------------
def _matmul_kernel(*refs, has_bias, w_scale, m_valid, tm, mask_rows):
    if has_bias:
        x_ref, w_ref, b_ref, o_ref, amax_ref, acc_ref = refs
    else:
        x_ref, w_ref, o_ref, amax_ref, acc_ref = refs
        b_ref = None

    # NOTE: keep program_id/num_programs at kernel top level only (calling them
    # inside a pl.when body breaks the interpret/CPU fallback lowering).
    i = pl.program_id(0)
    k = pl.program_id(2)
    nk = pl.num_programs(2)

    @pl.when(k == 0)
    def _():
        acc_ref[...] = jnp.zeros_like(acc_ref)

    # int8 weight codes -> bf16 for the MXU (VPU cast hidden under the matmul).
    w_bf16 = w_ref[...].astype(jnp.float32).astype(jnp.bfloat16)
    acc_ref[...] += jnp.dot(x_ref[...], w_bf16,
                            preferred_element_type=jnp.float32)

    @pl.when(k == nk - 1)
    def _():
        res = acc_ref[...] * w_scale            # fold weight quant scale here
        if has_bias:
            res = res + b_ref[...]
        o_ref[...] = res.astype(o_ref.dtype)    # bf16 intermediate
        if mask_rows:
            # Mask padded rows (they hold broadcast bias) out of the abs-max.
            row = jax.lax.broadcasted_iota(jnp.int32, res.shape, 0) + i * tm
            res = jnp.where(row < m_valid, res, 0.0)
        amax_ref[...] = jnp.broadcast_to(jnp.max(jnp.abs(res)), amax_ref.shape)


def linear_matmul(x, w_codes, bias_p, w_scale, *, tm_max=512, tn_max=512,
                  tk_max=512):
    """x: (M, K) float; w_codes: (Kp, Np) int8 pre-padded quant codes;
    bias_p: (1, Np) f32 pre-padded fake-quantized bias or None;
    w_scale: python float (per-tensor weight quant scale).

    Returns (out (Mp, Np) bf16, abs-max over the valid (M, N) region)."""
    M, K = x.shape
    Kp, Np = w_codes.shape
    assert Kp >= K and Kp % 128 == 0 and Np % 128 == 0

    tm = min(tm_max, _round_up(M, 8))
    tn = _pick_tile(Np, 128, tn_max)
    tk = _pick_tile(Kp, 128, tk_max)
    Mp = _round_up(M, tm)
    gm, gn, gk = Mp // tm, Np // tn, Kp // tk

    xb = x if x.dtype == jnp.bfloat16 else x.astype(jnp.bfloat16)
    if (Mp, Kp) != (M, K):
        xb = jnp.pad(xb, ((0, Mp - M), (0, Kp - K)))

    has_bias = bias_p is not None
    in_specs = [
        pl.BlockSpec((tm, tk), lambda i, j, k: (i, k)),
        pl.BlockSpec((tk, tn), lambda i, j, k: (k, j)),
    ]
    args = [xb, w_codes]
    if has_bias:
        in_specs.append(pl.BlockSpec((1, tn), lambda i, j, k: (0, j)))
        args.append(bias_p)

    out, amax_tiles = pl.pallas_call(
        functools.partial(_matmul_kernel, has_bias=has_bias,
                          w_scale=float(w_scale), m_valid=M, tm=tm,
                          mask_rows=(Mp != M)),
        out_shape=(
            jax.ShapeDtypeStruct((Mp, Np), jnp.bfloat16),
            jax.ShapeDtypeStruct((gm * 8, gn * 128), jnp.float32),
        ),
        grid_spec=pltpu.PrefetchScalarGridSpec(
            num_scalar_prefetch=0,
            grid=(gm, gn, gk),
            in_specs=in_specs,
            out_specs=(
                pl.BlockSpec((tm, tn), lambda i, j, k: (i, j)),
                pl.BlockSpec((8, 128), lambda i, j, k: (i, j)),
            ),
            scratch_shapes=[pltpu.VMEM((tm, tn), jnp.float32)],
        ),
        compiler_params=pltpu.CompilerParams(
            dimension_semantics=("parallel", "parallel", "arbitrary")),
    )(*args)

    return out, jnp.max(amax_tiles)


# ----------------------------------------------------------------------------
# Tiled per-tensor fake-quant (+ fused ReLU).  The [scale, 1/scale] pair is
# scalar-prefetched into SMEM; the kernel is a pure elementwise pass.
# ----------------------------------------------------------------------------
def _quant_relu_kernel(scale_ref, x_ref, o_ref, *, apply_relu):
    scale = scale_ref[0]
    inv_scale = scale_ref[1]
    x = x_ref[...].astype(jnp.float32)
    q = jnp.round(x * inv_scale) * scale
    q = jnp.where(scale > 0.0, q, x)        # all-zero tensor passes through
    if apply_relu:
        q = jnp.maximum(q, 0.0)
    o_ref[...] = q.astype(o_ref.dtype)


def fake_quant_2d(x, scale_inv, *, apply_relu=False, out_dtype=jnp.float32,
                  tr_max=512, tc_max=1024):
    """Fake-quantize a 2-D array with precomputed [scale, 1/scale] (shape (2,) f32)."""
    R, C = x.shape
    tr = _pick_tile(R, 8, tr_max)
    tc = _pick_tile(C, 128, tc_max)
    Rp, Cp = _round_up(R, tr), _round_up(C, tc)
    xp = x if (Rp, Cp) == (R, C) else jnp.pad(x, ((0, Rp - R), (0, Cp - C)))
    out = pl.pallas_call(
        functools.partial(_quant_relu_kernel, apply_relu=apply_relu),
        out_shape=jax.ShapeDtypeStruct((Rp, Cp), out_dtype),
        grid_spec=pltpu.PrefetchScalarGridSpec(
            num_scalar_prefetch=1,
            grid=(Rp // tr, Cp // tc),
            in_specs=[pl.BlockSpec((tr, tc), lambda i, j, s: (i, j))],
            out_specs=pl.BlockSpec((tr, tc), lambda i, j, s: (i, j)),
        ),
        compiler_params=pltpu.CompilerParams(
            dimension_semantics=("parallel", "parallel")),
    )(scale_inv, xp)
    return out if (Rp, Cp) == (R, C) else out[:R, :C]


def _scale_params(amax, bitwidth):
    qmax = float(2 ** (bitwidth - 1) - 1)
    scale = amax.astype(jnp.float32) / qmax
    inv = jnp.where(scale > 0.0, 1.0 / scale, 1.0)
    return jnp.stack([scale, inv]).astype(jnp.float32)


def _fake_quant_jax(x, bitwidth):
    """Plain-JAX fake quant for tiny tensors (bias) — not worth a kernel."""
    qmax = float(2 ** (bitwidth - 1) - 1)
    scale = jnp.max(jnp.abs(x)) / qmax
    safe = jnp.where(scale > 0.0, scale, 1.0)
    q = jnp.round(x / safe) * safe
    return jnp.where(scale > 0.0, q, x)


# ----------------------------------------------------------------------------
# Module
# ----------------------------------------------------------------------------
class LinearPallas:
    def __init__(self, in_features, out_features, bias=True, bitwidth=8,
                 key=None):
        self.in_features = in_features
        self.out_features = out_features
        self.bitwidth = int(bitwidth)
        key = jax.random.PRNGKey(0) if key is None else key
        wkey, bkey = jax.random.split(key)
        # kaiming_uniform_(a=sqrt(5)) on (out, in) == U(-1/sqrt(in), 1/sqrt(in))
        bound = 1.0 / math.sqrt(in_features)
        self.weight = jax.random.uniform(
            wkey, (out_features, in_features),
            minval=-bound, maxval=bound, dtype=jnp.float32)
        self.bias = (jax.random.uniform(
            bkey, (out_features,), minval=-bound, maxval=bound,
            dtype=jnp.float32) if bias else None)

        # ---- hoisted out of forward (weights frozen on the fwd path) ----
        qmax = float(2 ** (self.bitwidth - 1) - 1)
        w_amax = jnp.max(jnp.abs(self.weight))
        w_scale = w_amax / qmax
        safe = jnp.where(w_scale > 0.0, w_scale, 1.0)
        codes_t = jnp.round(self.weight.T / safe)           # (K, N) in [-qmax, qmax]
        Kp = _round_up(in_features, 128)
        Np = _round_up(out_features, 128)
        codes_t = jnp.pad(codes_t,
                          ((0, Kp - in_features), (0, Np - out_features)))
        # int8 codes + scalar scale: halves streamed weight bytes; exact in bf16.
        self.w_codes = codes_t.astype(jnp.int8)              # pre-padded, pre-T
        self.w_scale = float(w_scale)

        if self.bias is not None:
            bq = _fake_quant_jax(self.bias, self.bitwidth).astype(jnp.float32)
            self.bias_q = jnp.pad(bq, (0, Np - out_features)).reshape(1, Np)
        else:
            self.bias_q = None

    def __call__(self, x):
        lead = x.shape[:-1]
        x2 = x.reshape(-1, self.in_features)                 # handles >2-D inputs
        M = x2.shape[0]

        # matmul * w_scale + bias (+ per-tile abs-max of the valid region)
        ret_pad, amax = linear_matmul(x2, self.w_codes, self.bias_q,
                                      self.w_scale)

        # fused per-tensor fake-quant + ReLU epilogue (tiled, mem-bound)
        sp = _scale_params(amax, self.bitwidth)
        out_pad = fake_quant_2d(ret_pad, sp, apply_relu=True)

        out = out_pad[:M, :self.out_features]
        return out.reshape(lead + (self.out_features,))


if __name__ == "__main__":
    key = jax.random.PRNGKey(0)
    xkey, pkey = jax.random.split(key)

    # Small, deliberately non-aligned shapes (M=14, K=96, N=80) to exercise
    # the pad-to-tile / masked-amax paths.
    batch, seq, in_features, out_features = 2, 7, 96, 80
    x = jax.random.normal(xkey, (batch, seq, in_features), dtype=jnp.float32)

    mod = LinearPallas(in_features, out_features, bias=True, bitwidth=8,
                       key=pkey)
    y = mod(x)
    jax.block_until_ready(y)

    assert y.shape == (batch, seq, out_features)
    assert y.dtype == jnp.float32
    assert bool(jnp.all(y >= 0.0))          # ReLU applied

    # Pure-JAX reference mirroring the kernel's quantized arithmetic
    # (bf16 activations x int8 codes -> f32, scale, bias, bf16 intermediate,
    #  per-tensor fake-quant, ReLU).
    qmax = float(2 ** (mod.bitwidth - 1) - 1)
    x2 = x.reshape(-1, in_features).astype(jnp.bfloat16)
    codes = mod.w_codes[:in_features, :out_features].astype(jnp.bfloat16)
    ret = jnp.dot(x2, codes, preferred_element_type=jnp.float32) * mod.w_scale
    ret = ret + mod.bias_q[0, :out_features]
    amax = jnp.max(jnp.abs(ret))
    ret_bf16 = ret.astype(jnp.bfloat16).astype(jnp.float32)
    scale = amax / qmax
    safe = jnp.where(scale > 0.0, scale, 1.0)
    ref_q = jnp.where(scale > 0.0, jnp.round(ret_bf16 / safe) * safe, ret_bf16)
    ref_out = jnp.maximum(ref_q, 0.0).reshape(batch, seq, out_features)
    max_err = float(jnp.max(jnp.abs(y - ref_out)))
    assert max_err < 0.05, f"max abs err {max_err}"

    print("KERNEL_OK")
</pallas_src>

<mosaic_0001>
module attributes {stable_mosaic.version = 11 : i64} {
  func.func @_matmul_kernel(%arg0: i32, %arg1: i32, %arg2: i32, %arg3: memref<16x128xbf16, #tpu.memory_space<vmem>>, %arg4: memref<128x128xi8, #tpu.memory_space<vmem>>, %arg5: memref<1x128xf32, #tpu.memory_space<vmem>>, %arg6: memref<16x128xbf16, #tpu.memory_space<vmem>>, %arg7: memref<8x128xf32, #tpu.memory_space<vmem>>, %arg8: memref<16x128xf32, #tpu.memory_space<vmem>>) attributes {dimension_semantics = [#tpu.dimension_semantics<parallel>, #tpu.dimension_semantics<parallel>, #tpu.dimension_semantics<arbitrary>], iteration_bounds = array<i64: 1, 1, 1>, scalar_prefetch = 0 : i64, scratch_operands = 1 : i64, tpu.core_type = #tpu.core_type<tc>, window_params = [{transform_indices = @transform_0, window_bounds = array<i64: 16, 128>}, {transform_indices = @transform_1, window_bounds = array<i64: 128, 128>}, {transform_indices = @transform_2, window_bounds = array<i64: 1, 128>}, {transform_indices = @transform_3, window_bounds = array<i64: 16, 128>}, {transform_indices = @transform_4, window_bounds = array<i64: 8, 128>}]} {
    %c0_i32 = arith.constant 0 : i32
    %0 = arith.cmpi eq, %arg2, %c0_i32 : i32
    %1 = arith.extui %0 : i1 to i32
    %c0_i32_0 = arith.constant 0 : i32
    %2 = arith.cmpi ne, %1, %c0_i32_0 : i32
    scf.if %2 {
      %cst_10 = arith.constant 0.000000e+00 : f32
      %14 = vector.broadcast %cst_10 : f32 to vector<16x128xf32>
      %c0_11 = arith.constant 0 : index
      %c0_12 = arith.constant 0 : index
      %15 = vector.load %arg8[%c0_11, %c0_12] : memref<16x128xf32, #tpu.memory_space<vmem>>, vector<16x128xf32>
      tpu.vector_store %arg8[%c0_11, %c0_12], %14 {strides = array<i32>} : memref<16x128xf32, #tpu.memory_space<vmem>>, vector<16x128xf32>,
    } else {
    }
    %c0 = arith.constant 0 : index
    %c0_1 = arith.constant 0 : index
    %3 = vector.load %arg4[%c0, %c0_1] : memref<128x128xi8, #tpu.memory_space<vmem>>, vector<128x128xi8>
    %4 = arith.sitofp %3 : vector<128x128xi8> to vector<128x128xf32>
    %5 = arith.truncf %4 : vector<128x128xf32> to vector<128x128xbf16>
    %c0_2 = arith.constant 0 : index
    %c0_3 = arith.constant 0 : index
    %6 = vector.load %arg8[%c0_2, %c0_3] : memref<16x128xf32, #tpu.memory_space<vmem>>, vector<16x128xf32>
    %c0_4 = arith.constant 0 : index
    %c0_5 = arith.constant 0 : index
    %7 = vector.load %arg3[%c0_4, %c0_5] : memref<16x128xbf16, #tpu.memory_space<vmem>>, vector<16x128xbf16>
    %cst = arith.constant dense<0.000000e+00> : vector<16x128xf32>
    %8 = tpu.matmul %7, %5, %cst {dimension_numbers = #tpu.dot_dimension_numbers<[1], [0], [0], [1], [0, 0, 1, 1], [], []>} : vector<16x128xbf16>, vector<128x128xbf16>, vector<16x128xf32> -> vector<16x128xf32>
    %9 = arith.addf %6, %8 : vector<16x128xf32>
    %c0_6 = arith.constant 0 : index
    %c0_7 = arith.constant 0 : index
    %10 = vector.load %arg8[%c0_6, %c0_7] : memref<16x128xf32, #tpu.memory_space<vmem>>, vector<16x128xf32>
    tpu.vector_store %arg8[%c0_6, %c0_7], %9 {strides = array<i32>} : memref<16x128xf32, #tpu.memory_space<vmem>>, vector<16x128xf32>,
    %c0_i32_8 = arith.constant 0 : i32
    %11 = arith.cmpi eq, %arg2, %c0_i32_8 : i32
    %12 = arith.extui %11 : i1 to i32
    %c0_i32_9 = arith.constant 0 : i32
    %13 = arith.cmpi ne, %12, %c0_i32_9 : i32
    scf.if %13 {
      %c0_10 = arith.constant 0 : index
      %c0_11 = arith.constant 0 : index
      %14 = vector.load %arg8[%c0_10, %c0_11] : memref<16x128xf32, #tpu.memory_space<vmem>>, vector<16x128xf32>
      %cst_12 = arith.constant 8.03409086E-4 : f32
      %15 = vector.broadcast %cst_12 : f32 to vector<16x128xf32>
      %16 = arith.mulf %14, %15 : vector<16x128xf32>
      %c0_13 = arith.constant 0 : index
      %c0_14 = arith.constant 0 : index
      %17 = vector.load %arg5[%c0_13, %c0_14] : memref<1x128xf32, #tpu.memory_space<vmem>>, vector<1x128xf32>
      %18 = vector.broadcast %17 : vector<1x128xf32> to vector<16x128xf32>
      %19 = arith.addf %16, %18 : vector<16x128xf32>
      %20 = arith.truncf %19 : vector<16x128xf32> to vector<16x128xbf16>
      %c0_15 = arith.constant 0 : index
      %c0_16 = arith.constant 0 : index
      %21 = vector.load %arg6[%c0_15, %c0_16] : memref<16x128xbf16, #tpu.memory_space<vmem>>, vector<16x128xbf16>
      tpu.vector_store %arg6[%c0_15, %c0_16], %20 {strides = array<i32>} : memref<16x128xbf16, #tpu.memory_space<vmem>>, vector<16x128xbf16>,
      %22 = tpu.iota {dimensions = array<i32: 0>} : vector<16x128xi32>
      %c16_i32 = arith.constant 16 : i32
      %23 = arith.muli %arg0, %c16_i32 : i32
      %24 = vector.broadcast %23 : i32 to vector<16x128xi32>
      %25 = arith.addi %22, %24 : vector<16x128xi32>
      %c14_i32 = arith.constant 14 : i32
      %26 = vector.broadcast %c14_i32 : i32 to vector<16x128xi32>
      %27 = arith.cmpi slt, %25, %26 : vector<16x128xi32>
      %cst_17 = arith.constant 0.000000e+00 : f32
      %28 = vector.broadcast %cst_17 : f32 to vector<16x128xf32>
      %29 = arith.select %27, %19, %28 : vector<16x128xi1>, vector<16x128xf32>
      %30 = math.absf %29 : vector<16x128xf32>
      %31 = vector.shape_cast %30 : vector<16x128xf32> to vector<1x16x128xf32>
      %cst_18 = arith.constant dense<0xFF800000> : vector<1xf32>
      %32 = vector.multi_reduction <maximumf>, %31, %cst_18 [1, 2] : vector<1x16x128xf32> to vector<1xf32>
      %33 = vector.shape_cast %32 : vector<1xf32> to vector<1x1x1xf32>
      %34 = vector.extract %33[0, 0, 0] : f32 from vector<1x1x1xf32>
      %35 = vector.broadcast %34 : f32 to vector<8x128xf32>
      %c0_19 = arith.constant 0 : index
      %c0_20 = arith.constant 0 : index
      %36 = vector.load %arg7[%c0_19, %c0_20] : memref<8x128xf32, #tpu.memory_space<vmem>>, vector<8x128xf32>
      tpu.vector_store %arg7[%c0_19, %c0_20], %35 {strides = array<i32>} : memref<8x128xf32, #tpu.memory_space<vmem>>, vector<8x128xf32>,
    } else {
    }
    return
  }
  func.func @transform_0(%arg0: i32, %arg1: i32, %arg2: i32) -> (i32, i32) {
    %c0_i32 = arith.constant 0 : i32
    return %arg0, %arg2 : i32, i32
  }
  func.func @transform_1(%arg0: i32, %arg1: i32, %arg2: i32) -> (i32, i32) {
    %c0_i32 = arith.constant 0 : i32
    return %arg2, %arg1 : i32, i32
  }
  func.func @transform_2(%arg0: i32, %arg1: i32, %arg2: i32) -> (i32, i32) {
    %c0_i32 = arith.constant 0 : i32
    %c0_i32_0 = arith.constant 0 : i32
    return %c0_i32, %arg1 : i32, i32
  }
  func.func @transform_3(%arg0: i32, %arg1: i32, %arg2: i32) -> (i32, i32) {
    %c0_i32 = arith.constant 0 : i32
    return %arg0, %arg1 : i32, i32
  }
  func.func @transform_4(%arg0: i32, %arg1: i32, %arg2: i32) -> (i32, i32) {
    %c0_i32 = arith.constant 0 : i32
    return %arg0, %arg1 : i32, i32
  }
}

</mosaic_0001>

<bundles_post_ra>
// kernel: tpu_custom_call.1
= control target key start
LH: loop header
LB: loop body
LE: loop exit
PB: predicated region body
PF: predicated region fallthrough
CT: control target
= control target key end

     0   :  { %10 = vsyncpa [#allocation4], 0  ;;  %s400_s0 = inlined_call_operand.hbm [shape: bf16[16,128], index: 0, kind: input, shape index: {}]   ;;  %s401_s1 = inlined_call_operand.hbm [shape: s8[128,128], index: 1, kind: input, shape index: {}]   ;;  %s402_s2 = inlined_call_operand.vmem [shape: f32[1,128], index: 2, kind: input, shape index: {}]   ;;  %s403_s3 = inlined_call_operand.hbm [shape: bf16[16,128], index: 3, kind: output, shape index: {0}]   ;;  %s404_s4 = inlined_call_operand.hbm [shape: f32[8,128], index: 4, kind: output, shape index: {1}]  }
   0x1   :  { %11 = vsyncpa [#allocation7], 0 }
   0x2   :  { %12 = vsyncpa [#allocation5], 0 }
   0x3   :  { %13 = vsyncpa [#allocation10], 0  ;;  %s344_s15 = smov [#allocation3]  }
   0x4   :  { %s19_s16 = sshll.u32 %s344_s15, 4  ;;  %s20_s16 = int_to_ptr.vmem [resolvable:$true] %s19_s16 }
   0x5   :  { %s264_s17 = scalar_lea.vmem %s20_s16, 128  ;;  %p269_p1 = scmp.lt.s32.totalorder %s20_s16, %s20_s16 }
   0x6   :  { %p265_p0 = scmp.ne.s32.totalorder %s20_s16, %s264_s17  ;;  %p270_p2 = scmp.lt.s32.totalorder %s264_s17, %s264_s17 }
   0x8   :  { %p271_p3 = por %p270_p2, %p269_p1 }
   0xa   :  { %p272_p4 = pnand %p271_p3, %p265_p0 }
   0xc   :  { %275 = shalt.err (!%p272_p4)
}
   0xd   :  { %s345_s18 = smov 64   ;;  %s346_s19 = smov 4  }
   0xe   :  { %25 = dma.hbm_to_vmem [thread:$0]  %s400_s0, 128, %s20_s16, [#allocation4], %s345_s18, %s345_s18, %s346_s19  }
   0xf   :  { %s347_s22 = smov [#allocation6]  }
  0x10   :  { %s31_s23 = sshll.u32 %s347_s22, 4  ;;  %s32_s23 = int_to_ptr.vmem [resolvable:$true] %s31_s23 }
  0x11   :  { %s284_s24 = scalar_lea.vmem %s32_s23, 512  ;;  %p289_p6 = scmp.lt.s32.totalorder %s32_s23, %s32_s23 }
  0x12   :  { %p285_p5 = scmp.ne.s32.totalorder %s32_s23, %s284_s24  ;;  %p290_p7 = scmp.lt.s32.totalorder %s284_s24, %s284_s24 }
  0x14   :  { %p291_p8 = por %p290_p7, %p289_p6 }
  0x16   :  { %p292_p9 = pnand %p291_p8, %p285_p5 }
  0x18   :  { %295 = shalt.err (!%p292_p9)
}
  0x19   :  { %s348_s25 = smov 128   ;;  %s349_s26 = smov 8  }
  0x1a   :  { %37 = dma.hbm_to_vmem [thread:$0]  %s401_s1, 512, %s32_s23, [#allocation7], %s348_s25, %s348_s25, %s349_s26  }
  0x1b   :  { %336 = dma.done.wait [#allocation4], 128  }
  0x1c   :  { %337 = vsyncadd [#allocation4], 4294967168 }
  0x1d   :  { %338 = dma.done.wait [#allocation7], 512  }
  0x1e   :  { %339 = vsyncadd [#allocation7], 4294966784  ;;  %v350_v0 = vmov 0.0   ;;  %vm351_vm0 = vmmov 0   ;;  %v56_v1 = vld [vmem:[#allocation6 + $0x18] sm:$0xff]  ;;  %v55_v4 = vld [vmem:[#allocation6 + $0x10] sm:$0xff]  ;;  %v146_v14 = vlaneseq }
  0x1f   :  { %223 = vmatprep.subr.bf16.mxu0 %v350_v0  ;;  %239 = vmatprep.mubr.msk.bf16.mxu0 %vm351_vm0, %v350_v0  ;;  %v64_v2 = vunpack.c.h.s8.bf16 %v56_v1  ;;  %v63_v3 = vunpack.c.l.s8.bf16 %v56_v1  ;;  %v62_v5 = vunpack.c.h.s8.bf16 %v55_v4  ;;  %v61_v6 = vunpack.c.l.s8.bf16 %v55_v4  ;;  %v54_v7 = vld [vmem:[#allocation6 + $0x8] sm:$0xff]  ;;  %v53_v10 = vld [vmem:[#allocation6] sm:$0xff]  ;;  %v255_v13 = vld [vmem:[#allocation3] sm:$0xff]   ;;  %s352_s29 = smov [#allocation8]  }
  0x20   :  { %v60_v8 = vunpack.c.h.s8.bf16 %v54_v7  ;;  %v59_v9 = vunpack.c.l.s8.bf16 %v54_v7  ;;  %v58_v11 = vunpack.c.h.s8.bf16 %v53_v10  ;;  %v57_v12 = vunpack.c.l.s8.bf16 %v53_v10  ;;  %v204_v20 = vld [vmem:[%s402_s2] ss:$0 sm:$0xff]  ;;  %s176_s30 = sshll.u32 %s352_s29, 4  ;;  %s177_s30 = int_to_ptr.vmem [resolvable:$true] %s176_s30 }
  0x21   :  { %224 = vmatpush3.bf16.msra.mxu0 %v64_v2  ;;  %v147_v15 = vshrl.u32 %v146_v14, 7  ;;  %s296_s5 = scalar_lea.vmem %s177_s30, 128  ;;  %p301_p11 = scmp.lt.s32.totalorder %s177_s30, %s177_s30 }
  0x22   :  { %225 = vmatprep.subr.bf16.mxu0 %v350_v0  ;;  %p297_p10 = scmp.ne.s32.totalorder %s177_s30, %s296_s5  ;;  %p302_p12 = scmp.lt.s32.totalorder %s296_s5, %s296_s5 }
  0x23   :  { %v148_v19 = vadd.s32 8, %v147_v15 }
  0x24   :  { %p303_p13 = por %p302_p12, %p301_p11 }
  0x25   :  { %226 = vmatpush3.bf16.msra.mxu0 %v63_v3  ;;  %vm154_vm1 = vcmp.lt.s32.totalorder %v148_v19, 14 }
  0x26   :  { %227 = vmatprep.subr.bf16.mxu0 %v350_v0  ;;  %p304_p0 = pnand %p303_p13, %p297_p10 }
  0x29   :  { %228 = vmatpush3.bf16.msra.mxu0 %v62_v5 }
  0x2a   :  { %229 = vmatprep.subr.bf16.mxu0 %v350_v0 }
  0x2d   :  { %230 = vmatpush3.bf16.msra.mxu0 %v61_v6 }
  0x2e   :  { %231 = vmatprep.subr.bf16.mxu0 %v350_v0 }
  0x31   :  { %232 = vmatpush3.bf16.msra.mxu0 %v60_v8 }
  0x32   :  { %233 = vmatprep.subr.bf16.mxu0 %v350_v0 }
  0x35   :  { %234 = vmatpush3.bf16.msra.mxu0 %v59_v9 }
  0x36   :  { %235 = vmatprep.subr.bf16.mxu0 %v350_v0 }
  0x39   :  { %236 = vmatpush3.bf16.msra.mxu0 %v58_v11 }
  0x3a   :  { %237 = vmatprep.subr.bf16.mxu0 %v350_v0 }
  0x3d   :  { %238 = vmatpush3.bf16.msra.mxu0 %v57_v12 }
  0x40   :  { %240 = vmatmul.mubr.bf16.vlgmr.msra.gmra.mxu0 %v255_v13 }
 0x100   :  { %v109_v16 = vpop.f32.mrf.mxu0 }
 0x101   :  { %v125_v17 = vmul.f32 0.0008034091, %v109_v16 }
 0x102   :  { %v241_v18 = vpop.f32.mrf.mxu0 }
 0x103   :  { %v134_v23 = vadd.f32 %v204_v20, %v125_v17 }
 0x104   :  { %v112_v21 = vpop.f32.mrf.mxu0 }
 0x105   :  { %v126_v22 = vmul.f32 0.0008034091, %v112_v21  ;;  %v157_v28 = vand.u32 2147483647, %v134_v23 }
 0x106   :  { %v242_v24 = vpop.f32.mrf.mxu0 }
 0x107   :  { %v135_v25 = vadd.f32 %v204_v20, %v126_v22 }
 0x109   :  { %v156_v26 = vsel %vm154_vm1, %v135_v25, 0.0  ;;  %v212_v27 = vpack.c.bf16 %v135_v25, %v134_v23 }
 0x10a   :  { %v158_v29 = vand.u32 2147483647, %v156_v26 }
 0x10b   :  { %213 = vst [vmem:[#allocation8] sm:$0xff] %v212_v27  }
 0x10c   :  { %v159_v30 = vmax.f32.f32 %v157_v28, %v158_v29 }
 0x10e   :  { %160 = vmax.xlane.f32.xlu0 %v159_v30 }
 0x10f   :  { %307 = shalt.err (!%p304_p0)
}
 0x110   :  { %182 = dma.vmem_to_hbm [thread:$0]  %s177_s30, 128, %s403_s3, [#allocation5], %s345_s18, %s345_s18, %s346_s19  }
 0x111   :  { %s353_s7 = smov [#allocation9]  }
 0x112   :  { %s189_s8 = sshll.u32 %s353_s7, 4  ;;  %s190_s8 = int_to_ptr.vmem [resolvable:$true] %s189_s8 }
 0x113   :  { %s316_s10 = scalar_lea.vmem %s190_s8, 128  ;;  %p321_p2 = scmp.lt.s32.totalorder %s190_s8, %s190_s8 }
 0x114   :  { %p317_p1 = scmp.ne.s32.totalorder %s190_s8, %s316_s10  ;;  %p322_p3 = scmp.lt.s32.totalorder %s316_s10, %s316_s10 }
 0x116   :  { %p323_p4 = por %p322_p3, %p321_p2 }
 0x118   :  { %p324_p5 = pnand %p323_p4, %p317_p1 }
 0x197   :  { %v161_v31 = vpop.xlane.xlu0 %160 }
 0x198   :  { %v162_v32 = vrot.slane %v161_v31, 4 }
 0x19a   :  { %v163_v33 = vmax.f32 %v161_v31, %v162_v32 }
 0x19c   :  { %v164_v34 = vrot.slane %v163_v33, 2 }
 0x19e   :  { %v165_v35 = vmax.f32 %v163_v33, %v164_v34 }
 0x1a0   :  { %v166_v36 = vrot.slane %v165_v35, 1 }
 0x1a2   :  { %v167_v37 = vmax.f32 %v165_v35, %v166_v36 }
 0x1a4   :  { %243 = vpush %v167_v37 }
 0x1d5   :  { %s244_s9 = spop %243 }
 0x1d6   :  { %v169_v38 = vstv %s244_s9 }
 0x1d7   :  { %170 = vst [vmem:[#allocation9] sm:$0xff] %v169_v38 }
 0x1d8   :  { %327 = shalt.err (!%p324_p5)
}
 0x1d9   :  { %192 = dma.vmem_to_hbm [thread:$0]  %s190_s8, 128, %s404_s4, [#allocation10]  }
 0x1da   :  { %340 = dma.done.wait [#allocation5], 128  }
 0x1db   :  { %341 = vsyncadd [#allocation5], 4294967168 }
 0x1dc   :  { %342 = dma.done.wait [#allocation10], 128  }
 0x1dd   :  { %343 = vsyncadd [#allocation10], 4294967168 }
 0x1de   :  { %199 = vsyncpa [#allocation4], 1 }
 0x1df   :  { %200 = vsyncpa [#allocation7], 1 }
 0x1e0   :  { %201 = vsyncpa [#allocation5], 1 }
 0x1e1   :  { %202 = vsyncpa [#allocation10], 1 }

</bundles_post_ra>
